<compile_context>
chip_gen: v7x
topology: tpu7x:2x2x1
jax: 0.10.0
libtpu: 0.0.40
codegen_flags: <defaults>
</compile_context>

<pallas_src>
import functools
import math

import jax
import jax.numpy as jnp
from jax.experimental import pallas as pl
from jax.experimental.pallas import tpu as pltpu

_LANE = 128
_ROW_ALIGN = 16                       # satisfies both f32 (8,128) and bf16 (16,128) tiling
_MAX_TM = 1024
_DEFAULT_VMEM_CAP = 64 * 1024 * 1024  # safe default for every generation (v7x = 64 MiB)


def _round_up(x: int, m: int) -> int:
    return ((x + m - 1) // m) * m


def _vmem_budget_bytes() -> int:
    """Generation-aware usable-VMEM budget (capacity minus compiler headroom)."""
    cap = _DEFAULT_VMEM_CAP
    try:
        info = pltpu.get_tpu_info()
        cap_attr = getattr(info, "vmem_capacity_bytes", None)
        if cap_attr:
            cap = int(cap_attr)
    except Exception:
        pass
    # Leave ~16 MiB for compiler-internal scratch / activation temps.
    return max(cap - 16 * 1024 * 1024, 32 * 1024 * 1024)


def _apply_activation(y, activation: str, true_dim: int):
    """Activation on a lane-padded (tm, D_pad) f32 tile; true_dim = unpadded D."""
    if activation == "relu":
        return jnp.maximum(y, 0.0)
    if activation == "leaky_relu":
        return jnp.where(y >= 0.0, y, 0.01 * y)  # torch default slope 0.01
    if activation == "softplus":
        # torch default beta=1, threshold=20
        return jnp.where(y > 20.0, y, jnp.log1p(jnp.exp(jnp.minimum(y, 20.0))))
    if activation == "softmax":
        if true_dim != y.shape[-1]:
            # Mask padded lanes so they do not pollute max / denominator.
            lane = jax.lax.broadcasted_iota(jnp.int32, y.shape, dimension=1)
            y = jnp.where(lane < true_dim, y, -1e30)
        m = jnp.max(y, axis=-1, keepdims=True)
        e = jnp.exp(y - m)
        s = jnp.sum(e, axis=-1, keepdims=True)
        return e / s  # exact division: output-facing softmax stays exact
    raise ValueError(f"unknown activation: {activation}")


# ----------------------------------------------------------------------------
# Fused kernel: h = x; for each layer: h = act(h @ W_l + b_l); out = h
# refs = (x_ref, w0, b0, w1, b1, ..., o_ref); static unroll over layers.
# Weights arrive already in compute_dtype (pre-cast in the wrapper).
# ----------------------------------------------------------------------------
def _fused_mlp_kernel(*refs, activation: str, true_out_dims, compute_dtype):
    x_ref = refs[0]
    o_ref = refs[-1]
    param_refs = refs[1:-1]
    n_layers = len(param_refs) // 2

    h_op = x_ref[...]                       # compute_dtype MXU operand
    h_f32 = None
    for i in range(n_layers):
        w = param_refs[2 * i][...]          # compute_dtype, VMEM-resident
        b = param_refs[2 * i + 1][...]      # f32 (1, Dout_pad), broadcasts over rows
        y = jnp.dot(h_op, w, preferred_element_type=jnp.float32) + b
        h_f32 = _apply_activation(y, activation, true_out_dims[i])
        if i + 1 < n_layers:
            h_op = h_f32.astype(compute_dtype)
    o_ref[...] = h_f32.astype(o_ref.dtype)


# ----------------------------------------------------------------------------
# Parameter preparation: pad + cast ONCE (hoisted out of the forward pass).
# ----------------------------------------------------------------------------
def prepare_params(params, compute_dtype=jnp.bfloat16):
    """params: list of (w:(Din,Dout), b:(1,Dout)). Returns (flat padded tuple, dims)."""
    dims = [params[0][0].shape[0]] + [w.shape[1] for (w, _) in params]
    dims_pad = [_round_up(d, _LANE) for d in dims]
    flat = []
    for i, (w, b) in enumerate(params):
        din, dout = w.shape
        w_p = jnp.pad(w.astype(jnp.float32),
                      ((0, dims_pad[i] - din), (0, dims_pad[i + 1] - dout)))
        flat.append(w_p.astype(compute_dtype))        # weights stored in compute dtype
        b_p = jnp.pad(b.astype(jnp.float32).reshape(1, dout),
                      ((0, 0), (0, dims_pad[i + 1] - dout)))
        flat.append(b_p)                              # bias stays f32 (post-accumulate add)
    return tuple(flat), tuple(dims)


# ----------------------------------------------------------------------------
# Forward wrapper: batch tiling, BlockSpecs, cost estimate.
# ----------------------------------------------------------------------------
@functools.partial(jax.jit, static_argnames=("dims", "activation", "compute_dtype"))
def mlp_forward(x, padded_params, dims, activation, compute_dtype=jnp.bfloat16):
    B, Din = x.shape
    assert Din == dims[0]
    n_layers = len(dims) - 1
    dims_pad = [_round_up(d, _LANE) for d in dims]

    elt = jnp.dtype(compute_dtype).itemsize
    weight_bytes = sum(dims_pad[i] * dims_pad[i + 1] for i in range(n_layers)) * elt
    bias_bytes = sum(dims_pad[1:]) * 4
    param_bytes = weight_bytes + bias_bytes           # single-buffered (resident)

    budget = _vmem_budget_bytes()
    # Per batch-row VMEM: double-buffered x tile + double-buffered out tile + f32 temps.
    per_row = 2 * dims_pad[0] * elt + 2 * dims_pad[-1] * 4 + 6 * max(dims_pad) * 4
    avail = budget - param_bytes
    assert avail >= per_row * _ROW_ALIGN, (
        f"fused-MLP weights ({param_bytes} B) exceed the {budget} B VMEM budget; "
        "TODO(synk): stream (tk, tn) weight blocks from HBM via pltpu.emit_pipeline")

    # Largest batch tile that fits; keep >=2 grid steps for megacore when B allows.
    tm_cap = max(_ROW_ALIGN, min(_MAX_TM, (avail // per_row) // _ROW_ALIGN * _ROW_ALIGN))
    if B > _ROW_ALIGN:
        target = _round_up(-(-B // 2), _ROW_ALIGN)
    else:
        target = _ROW_ALIGN
    tm = int(min(tm_cap, target))
    B_pad = _round_up(max(B, tm), tm)
    grid = (B_pad // tm,)

    # Pad + cast the activations (per-call; parameters were prepared once).
    x_p = jnp.pad(x.astype(jnp.float32),
                  ((0, B_pad - B), (0, dims_pad[0] - Din))).astype(compute_dtype)

    # BlockSpecs: batch-tiled activations, pinned (single-copy) resident params.
    in_specs = [pl.BlockSpec((tm, dims_pad[0]), lambda i: (i, 0))]
    for _ in range(n_layers):
        in_specs.append(pl.BlockSpec(memory_space=pltpu.MemorySpace.VMEM))  # weight
        in_specs.append(pl.BlockSpec(memory_space=pltpu.MemorySpace.VMEM))  # bias
    out_spec = pl.BlockSpec((tm, dims_pad[-1]), lambda i: (i, 0))

    flops = 2 * B_pad * sum(dims_pad[i] * dims_pad[i + 1] for i in range(n_layers))
    transcendentals = (B_pad * sum(dims_pad[1:])
                       if activation in ("softplus", "softmax") else 0)
    bytes_accessed = (B_pad * dims_pad[0] * elt + B_pad * dims_pad[-1] * 4
                      + param_bytes)

    kernel = functools.partial(
        _fused_mlp_kernel,
        activation=activation,
        true_out_dims=tuple(dims[1:]),
        compute_dtype=compute_dtype,
    )

    out_padded = pl.pallas_call(
        kernel,
        out_shape=jax.ShapeDtypeStruct((B_pad, dims_pad[-1]), jnp.float32),
        grid=grid,
        in_specs=in_specs,
        out_specs=out_spec,
        compiler_params=pltpu.CompilerParams(
            dimension_semantics=("parallel",),     # megacore sharding on v7x
            vmem_limit_bytes=int(budget),
        ),
        cost_estimate=pl.CostEstimate(
            flops=flops,
            transcendentals=transcendentals,
            bytes_accessed=bytes_accessed,
        ),
    )(x_p, *padded_params)

    return out_padded[:B, :dims[-1]]


# ----------------------------------------------------------------------------
# Parameter construction + pure-JAX reference (plain JAX glue).
# ----------------------------------------------------------------------------
def init_params(key, input_dim, hidden_dim, output_dim, num_layers):
    """Matches nn.Linear's default uniform(-1/sqrt(fan_in), 1/sqrt(fan_in)) init."""
    dims = [input_dim] + [hidden_dim] * num_layers + [output_dim]
    params = []
    for i in range(1, len(dims)):
        fan_in, fan_out = dims[i - 1], dims[i]
        key, kw, kb = jax.random.split(key, 3)
        bound = 1.0 / math.sqrt(fan_in)
        w = jax.random.uniform(kw, (fan_in, fan_out), jnp.float32, -bound, bound)
        b = jax.random.uniform(kb, (1, fan_out), jnp.float32, -bound, bound)
        params.append((w, b))
    return params


def model_forward_ref(x, params, activation: str):
    h = x
    for w, b in params:
        h = jnp.dot(h, w, precision=jax.lax.Precision.HIGHEST) + b
        if activation == "relu":
            h = jnp.maximum(h, 0.0)
        elif activation == "leaky_relu":
            h = jnp.where(h >= 0.0, h, 0.01 * h)
        elif activation == "softplus":
            h = jnp.where(h > 20.0, h, jnp.log1p(jnp.exp(jnp.minimum(h, 20.0))))
        elif activation == "softmax":
            h = jax.nn.softmax(h, axis=-1)
    return h


if __name__ == "__main__":
    # Small config consistent with the module's ModelConfig.
    input_dim, hidden_dim, output_dim, num_layers = 16, 32, 8, 2
    batch = 8

    key = jax.random.PRNGKey(0)
    key, kx = jax.random.split(key)
    x = jax.random.normal(kx, (batch, input_dim), jnp.float32)
    params = init_params(key, input_dim, hidden_dim, output_dim, num_layers)

    for act in ("relu", "leaky_relu", "softplus", "softmax"):
        ref = model_forward_ref(x, params, act)
        # Default fast path (bf16 MXU operands) and opt-in f32-accuracy path.
        for cdt, tol in ((jnp.bfloat16, 5e-2), (jnp.float32, 1e-4)):
            padded, dims = prepare_params(params, compute_dtype=cdt)
            out = jax.block_until_ready(
                mlp_forward(x, padded, dims, act, compute_dtype=cdt))
            assert out.shape == (batch, output_dim), out.shape
            assert jnp.allclose(out, ref, atol=tol, rtol=tol), (
                f"mismatch vs reference ({act}, {jnp.dtype(cdt).name})")

    print("KERNEL_OK")
</pallas_src>

<mosaic_0001>
module attributes {stable_mosaic.version = 11 : i64} {
  func.func @_fused_mlp_kernel(%arg0: i32, %arg1: memref<16x128xbf16, #tpu.memory_space<vmem>>, %arg2: memref<128x128xbf16, #tpu.memory_space<vmem>>, %arg3: memref<1x128xf32, #tpu.memory_space<vmem>>, %arg4: memref<128x128xbf16, #tpu.memory_space<vmem>>, %arg5: memref<1x128xf32, #tpu.memory_space<vmem>>, %arg6: memref<128x128xbf16, #tpu.memory_space<vmem>>, %arg7: memref<1x128xf32, #tpu.memory_space<vmem>>, %arg8: memref<16x128xf32, #tpu.memory_space<vmem>>) attributes {dimension_semantics = [#tpu.dimension_semantics<parallel>], iteration_bounds = array<i64: 1>, scalar_prefetch = 0 : i64, scratch_operands = 0 : i64, tpu.core_type = #tpu.core_type<tc>, window_params = [{transform_indices = @transform_0, window_bounds = array<i64: 16, 128>}, {pipeline_mode = #tpu.pipeline_mode<synchronous>, transform_indices = @transform_1, window_bounds = array<i64: 128, 128>}, {pipeline_mode = #tpu.pipeline_mode<synchronous>, transform_indices = @transform_2, window_bounds = array<i64: 1, 128>}, {pipeline_mode = #tpu.pipeline_mode<synchronous>, transform_indices = @transform_3, window_bounds = array<i64: 128, 128>}, {pipeline_mode = #tpu.pipeline_mode<synchronous>, transform_indices = @transform_4, window_bounds = array<i64: 1, 128>}, {pipeline_mode = #tpu.pipeline_mode<synchronous>, transform_indices = @transform_5, window_bounds = array<i64: 128, 128>}, {pipeline_mode = #tpu.pipeline_mode<synchronous>, transform_indices = @transform_6, window_bounds = array<i64: 1, 128>}, {transform_indices = @transform_7, window_bounds = array<i64: 16, 128>}]} {
    %c0 = arith.constant 0 : index
    %c0_0 = arith.constant 0 : index
    %0 = vector.load %arg1[%c0, %c0_0] : memref<16x128xbf16, #tpu.memory_space<vmem>>, vector<16x128xbf16>
    %c0_1 = arith.constant 0 : index
    %c0_2 = arith.constant 0 : index
    %1 = vector.load %arg2[%c0_1, %c0_2] : memref<128x128xbf16, #tpu.memory_space<vmem>>, vector<128x128xbf16>
    %c0_3 = arith.constant 0 : index
    %c0_4 = arith.constant 0 : index
    %2 = vector.load %arg3[%c0_3, %c0_4] : memref<1x128xf32, #tpu.memory_space<vmem>>, vector<1x128xf32>
    %cst = arith.constant dense<0.000000e+00> : vector<16x128xf32>
    %3 = tpu.matmul %0, %1, %cst {dimension_numbers = #tpu.dot_dimension_numbers<[1], [0], [0], [1], [0, 0, 1, 1], [], []>} : vector<16x128xbf16>, vector<128x128xbf16>, vector<16x128xf32> -> vector<16x128xf32>
    %4 = vector.broadcast %2 : vector<1x128xf32> to vector<16x128xf32>
    %5 = arith.addf %3, %4 : vector<16x128xf32>
    %cst_5 = arith.constant 0.000000e+00 : f32
    %6 = vector.broadcast %cst_5 : f32 to vector<16x128xf32>
    %7 = arith.maximumf %5, %6 : vector<16x128xf32>
    %8 = arith.truncf %7 : vector<16x128xf32> to vector<16x128xbf16>
    %c0_6 = arith.constant 0 : index
    %c0_7 = arith.constant 0 : index
    %9 = vector.load %arg4[%c0_6, %c0_7] : memref<128x128xbf16, #tpu.memory_space<vmem>>, vector<128x128xbf16>
    %c0_8 = arith.constant 0 : index
    %c0_9 = arith.constant 0 : index
    %10 = vector.load %arg5[%c0_8, %c0_9] : memref<1x128xf32, #tpu.memory_space<vmem>>, vector<1x128xf32>
    %cst_10 = arith.constant dense<0.000000e+00> : vector<16x128xf32>
    %11 = tpu.matmul %8, %9, %cst_10 {dimension_numbers = #tpu.dot_dimension_numbers<[1], [0], [0], [1], [0, 0, 1, 1], [], []>} : vector<16x128xbf16>, vector<128x128xbf16>, vector<16x128xf32> -> vector<16x128xf32>
    %12 = vector.broadcast %10 : vector<1x128xf32> to vector<16x128xf32>
    %13 = arith.addf %11, %12 : vector<16x128xf32>
    %cst_11 = arith.constant 0.000000e+00 : f32
    %14 = vector.broadcast %cst_11 : f32 to vector<16x128xf32>
    %15 = arith.maximumf %13, %14 : vector<16x128xf32>
    %16 = arith.truncf %15 : vector<16x128xf32> to vector<16x128xbf16>
    %c0_12 = arith.constant 0 : index
    %c0_13 = arith.constant 0 : index
    %17 = vector.load %arg6[%c0_12, %c0_13] : memref<128x128xbf16, #tpu.memory_space<vmem>>, vector<128x128xbf16>
    %c0_14 = arith.constant 0 : index
    %c0_15 = arith.constant 0 : index
    %18 = vector.load %arg7[%c0_14, %c0_15] : memref<1x128xf32, #tpu.memory_space<vmem>>, vector<1x128xf32>
    %cst_16 = arith.constant dense<0.000000e+00> : vector<16x128xf32>
    %19 = tpu.matmul %16, %17, %cst_16 {dimension_numbers = #tpu.dot_dimension_numbers<[1], [0], [0], [1], [0, 0, 1, 1], [], []>} : vector<16x128xbf16>, vector<128x128xbf16>, vector<16x128xf32> -> vector<16x128xf32>
    %20 = vector.broadcast %18 : vector<1x128xf32> to vector<16x128xf32>
    %21 = arith.addf %19, %20 : vector<16x128xf32>
    %cst_17 = arith.constant 0.000000e+00 : f32
    %22 = vector.broadcast %cst_17 : f32 to vector<16x128xf32>
    %23 = arith.maximumf %21, %22 : vector<16x128xf32>
    %c0_18 = arith.constant 0 : index
    %c0_19 = arith.constant 0 : index
    %24 = vector.load %arg8[%c0_18, %c0_19] : memref<16x128xf32, #tpu.memory_space<vmem>>, vector<16x128xf32>
    tpu.vector_store %arg8[%c0_18, %c0_19], %23 {strides = array<i32>} : memref<16x128xf32, #tpu.memory_space<vmem>>, vector<16x128xf32>,
    return
  }
  func.func @transform_0(%arg0: i32) -> (i32, i32) {
    %c0_i32 = arith.constant 0 : i32
    %c0_i32_0 = arith.constant 0 : i32
    return %arg0, %c0_i32 : i32, i32
  }
  func.func @transform_1(%arg0: i32) -> (i32, i32) {
    %c0_i32 = arith.constant 0 : i32
    %c0_i32_0 = arith.constant 0 : i32
    %c0_i32_1 = arith.constant 0 : i32
    return %c0_i32, %c0_i32_0 : i32, i32
  }
  func.func @transform_2(%arg0: i32) -> (i32, i32) {
    %c0_i32 = arith.constant 0 : i32
    %c0_i32_0 = arith.constant 0 : i32
    %c0_i32_1 = arith.constant 0 : i32
    return %c0_i32, %c0_i32_0 : i32, i32
  }
  func.func @transform_3(%arg0: i32) -> (i32, i32) {
    %c0_i32 = arith.constant 0 : i32
    %c0_i32_0 = arith.constant 0 : i32
    %c0_i32_1 = arith.constant 0 : i32
    return %c0_i32, %c0_i32_0 : i32, i32
  }
  func.func @transform_4(%arg0: i32) -> (i32, i32) {
    %c0_i32 = arith.constant 0 : i32
    %c0_i32_0 = arith.constant 0 : i32
    %c0_i32_1 = arith.constant 0 : i32
    return %c0_i32, %c0_i32_0 : i32, i32
  }
  func.func @transform_5(%arg0: i32) -> (i32, i32) {
    %c0_i32 = arith.constant 0 : i32
    %c0_i32_0 = arith.constant 0 : i32
    %c0_i32_1 = arith.constant 0 : i32
    return %c0_i32, %c0_i32_0 : i32, i32
  }
  func.func @transform_6(%arg0: i32) -> (i32, i32) {
    %c0_i32 = arith.constant 0 : i32
    %c0_i32_0 = arith.constant 0 : i32
    %c0_i32_1 = arith.constant 0 : i32
    return %c0_i32, %c0_i32_0 : i32, i32
  }
  func.func @transform_7(%arg0: i32) -> (i32, i32) {
    %c0_i32 = arith.constant 0 : i32
    %c0_i32_0 = arith.constant 0 : i32
    return %arg0, %c0_i32 : i32, i32
  }
}

</mosaic_0001>

<bundles_post_ra>
// kernel: mlp_forward.1
= control target key start
LH: loop header
LB: loop body
LE: loop exit
PB: predicated region body
PF: predicated region fallthrough
CT: control target
= control target key end

     0   :  { %12 = vsyncpa [#allocation3], 0  ;;  %s792_s0 = inlined_call_operand.vmem [shape: bf16[16,128], index: 0, kind: input, shape index: {}]   ;;  %s793_s1 = inlined_call_operand.hbm [shape: bf16[128,128], index: 1, kind: input, shape index: {}]   ;;  %s794_s2 = inlined_call_operand.vmem [shape: f32[1,128], index: 2, kind: input, shape index: {}]   ;;  %s795_s3 = inlined_call_operand.hbm [shape: bf16[128,128], index: 3, kind: input, shape index: {}]   ;;  %s796_s4 = inlined_call_operand.vmem [shape: f32[1,128], index: 4, kind: input, shape index: {}]   ;;  %s797_s5 = inlined_call_operand.hbm [shape: bf16[128,128], index: 5, kind: input, shape index: {}]   ;;  %s798_s6 = inlined_call_operand.vmem [shape: f32[1,128], index: 6, kind: input, shape index: {}]   ;;  %s799_s7 = inlined_call_operand.vmem [shape: f32[16,128], index: 7, kind: output, shape index: {}]  }
   0x1   :  { %13 = vsyncpa [#allocation5], 0  ;;  %s645_s24 = smov [#allocation4]   ;;  %s646_s26 = smov [#allocation2]  }
   0x2   :  { %s35_s25 = sshll.u32 %s645_s24, 4  ;;  %s21_s27 = sshll.u32 %s646_s26, 4  ;;  %s36_s25 = int_to_ptr.vmem [resolvable:$true] %s35_s25  ;;  %s692_s27 = int_to_ptr.vmem [resolvable:$true] %s21_s27 }
   0x3   :  { %s575_s30 = scalar_lea.hbm %s795_s3, 1024 }
   0x4   :  { %p576_p0 = scmp.ne.s32.totalorder %s795_s3, %s575_s30  ;;  %p579_p1 = scmp.lt.u32.totalorder %s575_s30, %s795_s3 }
   0x6   :  { %p581_p2 = pnand %p579_p1, %p576_p0 }
   0x8   :  { %584 = shalt.err (!%p581_p2)
}
   0x9   :  { %s585_s12 = scalar_lea.vmem %s36_s25, 1024  ;;  %p590_p4 = scmp.lt.s32.totalorder %s36_s25, %s36_s25 }
   0xa   :  { %p586_p3 = scmp.ne.s32.totalorder %s36_s25, %s585_s12  ;;  %p591_p5 = scmp.lt.s32.totalorder %s585_s12, %s585_s12 }
   0xc   :  { %p592_p6 = por %p591_p5, %p590_p4 }
   0xe   :  { %p593_p7 = pnand %p592_p6, %p586_p3 }
  0x10   :  { %596 = shalt.err (!%p593_p7)
}
  0x11   :  { %s647_s13 = smov 64   ;;  %s648_s14 = smov 4  }
  0x12   :  { %41 = dma.hbm_to_vmem [thread:$0]  %s795_s3, 1024, %s36_s25, [#allocation5], %s647_s13, %s647_s13, %s648_s14  }
  0x13   :  { %s597_s19 = scalar_lea.hbm %s793_s1, 1024 }
  0x14   :  { %p598_p8 = scmp.ne.s32.totalorder %s793_s1, %s597_s19  ;;  %p601_p9 = scmp.lt.u32.totalorder %s597_s19, %s793_s1 }
  0x16   :  { %p603_p10 = pnand %p601_p9, %p598_p8 }
  0x18   :  { %606 = shalt.err (!%p603_p10)
}
  0x19   :  { %s607_s24 = scalar_lea.vmem %s692_s27, 1024  ;;  %p612_p12 = scmp.lt.s32.totalorder %s692_s27, %s692_s27 }
  0x1a   :  { %p608_p11 = scmp.ne.s32.totalorder %s692_s27, %s607_s24  ;;  %p613_p13 = scmp.lt.s32.totalorder %s607_s24, %s607_s24 }
  0x1c   :  { %p614_p0 = por %p613_p13, %p612_p12 }
  0x1e   :  { %p615_p1 = pnand %p614_p0, %p608_p11 }
  0x20   :  { %618 = shalt.err (!%p615_p1)
}
  0x21   :  { %27 = dma.hbm_to_vmem [thread:$0]  %s793_s1, 1024, %s692_s27, [#allocation3], %s647_s13, %s647_s13, %s648_s14  }
  0x22   :  { %s649_s26 = smov [#allocation6]   ;;  %s619_s8 = scalar_lea.hbm %s797_s5, 1024 }
  0x23   :  { %s49_s28 = sshll.u32 %s649_s26, 4  ;;  %p620_p2 = scmp.ne.s32.totalorder %s797_s5, %s619_s8  ;;  %s50_s28 = int_to_ptr.vmem [resolvable:$true] %s49_s28 }
  0x24   :  { %p623_p3 = scmp.lt.u32.totalorder %s619_s8, %s797_s5 }
  0x26   :  { %p625_p4 = pnand %p623_p3, %p620_p2 }
  0x28   :  { %628 = shalt.err (!%p625_p4)
}
  0x29   :  { %s629_s15 = scalar_lea.vmem %s50_s28, 1024  ;;  %p634_p6 = scmp.lt.s32.totalorder %s50_s28, %s50_s28 }
  0x2a   :  { %p630_p5 = scmp.ne.s32.totalorder %s50_s28, %s629_s15  ;;  %p635_p7 = scmp.lt.s32.totalorder %s629_s15, %s629_s15 }
  0x2c   :  { %p636_p8 = por %p635_p7, %p634_p6 }
  0x2e   :  { %p637_p9 = pnand %p636_p8, %p630_p5 }
  0x30   :  { %640 = shalt.err (!%p637_p9)
}
  0x31   :  { %55 = dma.hbm_to_vmem [thread:$0]  %s797_s5, 1024, %s50_s28, [#allocation5], %s647_s13, %s647_s13, %s648_s14  }
  0x32   :  { %641 = dma.done.wait [#allocation3], 1024  }
  0x33   :  { %642 = vsyncadd [#allocation3], 4294966272 }
  0x34   :  { %643 = dma.done.wait [#allocation5], 2048  }
  0x35   :  { %644 = vsyncadd [#allocation5], 4294965248  ;;  %v650_v0 = vmov 0.0   ;;  %vm651_vm0 = vmmov 0   ;;  %v550_v1 = vld [vmem:[#allocation2] sm:$0xff]   ;;  %v551_v2 = vld [vmem:[#allocation2 + $0x8] sm:$0xff]  }
  0x36   :  { %483 = vmatprep.subr.bf16.mxu0 %v650_v0  ;;  %499 = vmatprep.mubr.msk.bf16.mxu0 %vm651_vm0, %v650_v0  ;;  %v552_v3 = vld [vmem:[#allocation2 + $0x10] sm:$0xff]   ;;  %v559_v4 = vld [vmem:[#allocation4] sm:$0xff]   ;;  %v553_v5 = vld [vmem:[#allocation2 + $0x18] sm:$0xff]  }
  0x37   :  { %503 = vmatprep.subr.bf16.mxu1 %v650_v0  ;;  %519 = vmatprep.mubr.msk.bf16.mxu1 %vm651_vm0, %v650_v0  ;;  %v560_v6 = vld [vmem:[#allocation4 + $0x8] sm:$0xff]   ;;  %v554_v7 = vld [vmem:[#allocation2 + $0x20] sm:$0xff]   ;;  %v561_v8 = vld [vmem:[#allocation4 + $0x10] sm:$0xff]  }
  0x38   :  { %484 = vmatpush3.bf16.msra.mxu0 %v550_v1  ;;  %504 = vmatpush3.bf16.msra.mxu1 %v559_v4  ;;  %v555_v9 = vld [vmem:[#allocation2 + $0x28] sm:$0xff]   ;;  %v562_v10 = vld [vmem:[#allocation4 + $0x18] sm:$0xff]   ;;  %v556_v11 = vld [vmem:[#allocation2 + $0x30] sm:$0xff]  }
  0x39   :  { %485 = vmatprep.subr.bf16.mxu0 %v650_v0  ;;  %505 = vmatprep.subr.bf16.mxu1 %v650_v0  ;;  %v563_v12 = vld [vmem:[#allocation4 + $0x20] sm:$0xff]   ;;  %v557_v13 = vld [vmem:[#allocation2 + $0x38] sm:$0xff]   ;;  %v564_v14 = vld [vmem:[#allocation4 + $0x28] sm:$0xff]  }
  0x3a   :  { %v558_v15 = vld [vmem:[%s792_s0] sm:$0xff]   ;;  %v565_v16 = vld [vmem:[#allocation4 + $0x30] sm:$0xff]   ;;  %v566_v17 = vld [vmem:[#allocation4 + $0x38] sm:$0xff]  }
  0x3b   :  { %v567_v18 = vld [vmem:[#allocation6] sm:$0xff]   ;;  %v568_v19 = vld [vmem:[#allocation6 + $0x8] sm:$0xff]   ;;  %v569_v20 = vld [vmem:[#allocation6 + $0x10] sm:$0xff]  }
  0x3c   :  { %486 = vmatpush3.bf16.msra.mxu0 %v551_v2  ;;  %506 = vmatpush3.bf16.msra.mxu1 %v560_v6  ;;  %v570_v21 = vld [vmem:[#allocation6 + $0x18] sm:$0xff]   ;;  %v571_v22 = vld [vmem:[#allocation6 + $0x20] sm:$0xff]   ;;  %v572_v23 = vld [vmem:[#allocation6 + $0x28] sm:$0xff]  }
  0x3d   :  { %487 = vmatprep.subr.bf16.mxu0 %v650_v0  ;;  %507 = vmatprep.subr.bf16.mxu1 %v650_v0  ;;  %v428_v24 = vld [vmem:[%s794_s2] ss:$0 sm:$0xff]  ;;  %v573_v34 = vld [vmem:[#allocation6 + $0x30] sm:$0xff]   ;;  %v574_v35 = vld [vmem:[#allocation6 + $0x38] sm:$0xff]  }
  0x3e   :  { %v438_v36 = vld [vmem:[%s796_s4] ss:$0 sm:$0xff] }
  0x3f   :  { %v447_v46 = vld [vmem:[%s798_s6] ss:$0 sm:$0xff] }
  0x40   :  { %488 = vmatpush3.bf16.msra.mxu0 %v552_v3  ;;  %508 = vmatpush3.bf16.msra.mxu1 %v561_v8 }
  0x41   :  { %489 = vmatprep.subr.bf16.mxu0 %v650_v0  ;;  %509 = vmatprep.subr.bf16.mxu1 %v650_v0 }
  0x44   :  { %490 = vmatpush3.bf16.msra.mxu0 %v553_v5  ;;  %510 = vmatpush3.bf16.msra.mxu1 %v562_v10 }
  0x45   :  { %491 = vmatprep.subr.bf16.mxu0 %v650_v0  ;;  %511 = vmatprep.subr.bf16.mxu1 %v650_v0 }
  0x48   :  { %492 = vmatpush3.bf16.msra.mxu0 %v554_v7  ;;  %512 = vmatpush3.bf16.msra.mxu1 %v563_v12 }
  0x49   :  { %493 = vmatprep.subr.bf16.mxu0 %v650_v0  ;;  %513 = vmatprep.subr.bf16.mxu1 %v650_v0 }
  0x4c   :  { %494 = vmatpush3.bf16.msra.mxu0 %v555_v9  ;;  %514 = vmatpush3.bf16.msra.mxu1 %v564_v14 }
  0x4d   :  { %495 = vmatprep.subr.bf16.mxu0 %v650_v0  ;;  %515 = vmatprep.subr.bf16.mxu1 %v650_v0 }
  0x50   :  { %496 = vmatpush3.bf16.msra.mxu0 %v556_v11  ;;  %516 = vmatpush3.bf16.msra.mxu1 %v565_v16 }
  0x51   :  { %497 = vmatprep.subr.bf16.mxu0 %v650_v0  ;;  %517 = vmatprep.subr.bf16.mxu1 %v650_v0 }
  0x54   :  { %498 = vmatpush3.bf16.msra.mxu0 %v557_v13  ;;  %518 = vmatpush3.bf16.msra.mxu1 %v566_v17 }
  0x55   :  { %523 = vmatprep.subr.bf16.mxu0 %v650_v0 }
  0x57   :  { %500 = vmatmul.mubr.bf16.vlgmr.msra.gmra.mrb[0].mxu0 %v558_v15 }
  0x58   :  { %539 = vmatprep.mubr.msk.bf16.mxu0 %vm651_vm0, %v650_v0  ;;  %524 = vmatpush3.bf16.msra.mxu0 %v567_v18 }
  0x59   :  { %525 = vmatprep.subr.bf16.mxu0 %v650_v0 }
  0x5c   :  { %526 = vmatpush3.bf16.msra.mxu0 %v568_v19 }
  0x5d   :  { %527 = vmatprep.subr.bf16.mxu0 %v650_v0 }
  0x60   :  { %528 = vmatpush3.bf16.msra.mxu0 %v569_v20 }
  0x61   :  { %529 = vmatprep.subr.bf16.mxu0 %v650_v0 }
  0x64   :  { %530 = vmatpush3.bf16.msra.mxu0 %v570_v21 }
  0x65   :  { %531 = vmatprep.subr.bf16.mxu0 %v650_v0 }
  0x68   :  { %532 = vmatpush3.bf16.msra.mxu0 %v571_v22 }
  0x69   :  { %533 = vmatprep.subr.bf16.mxu0 %v650_v0 }
  0x6c   :  { %534 = vmatpush3.bf16.msra.mxu0 %v572_v23 }
  0x6d   :  { %535 = vmatprep.subr.bf16.mxu0 %v650_v0 }
  0x70   :  { %536 = vmatpush3.bf16.msra.mxu0 %v573_v34 }
  0x71   :  { %537 = vmatprep.subr.bf16.mxu0 %v650_v0 }
  0x74   :  { %538 = vmatpush3.bf16.msra.mxu0 %v574_v35 }
 0x12a   :  { %v181_v25 = vpop.f32.mrb[0].mxu0 }
 0x12b   :  { %v182_v26 = vadd.f32 %v428_v24, %v181_v25  ;;  %v501_v27 = vpop.f32.mrb[1].mxu0 }
 0x12c   :  { %v184_v28 = vpop.f32.mrb[2].mxu0 }
 0x12d   :  { %v185_v29 = vadd.f32 %v428_v24, %v184_v28  ;;  %v502_v30 = vpop.f32.mrb[3].mxu0  ;;  %v188_v31 = vmax.f32 %v182_v26, 0.0 }
 0x12f   :  { %v189_v32 = vmax.f32 %v185_v29, 0.0 }
 0x131   :  { %v190_v33 = vpack.c.bf16 %v189_v32, %v188_v31 }
 0x133   :  { %520 = vmatmul.mubr.bf16.vlgmr.msra.gmra.mrb[0].mxu1 %v190_v33 }
 0x206   :  { %v296_v37 = vpop.f32.mrb[0].mxu1 }
 0x207   :  { %v297_v38 = vadd.f32 %v438_v36, %v296_v37  ;;  %v521_v39 = vpop.f32.mrb[1].mxu1 }
 0x208   :  { %v299_v40 = vpop.f32.mrb[2].mxu1 }
 0x209   :  { %v300_v41 = vadd.f32 %v438_v36, %v299_v40  ;;  %v522_v42 = vpop.f32.mrb[3].mxu1  ;;  %v303_v43 = vmax.f32 %v297_v38, 0.0 }
 0x20b   :  { %v304_v44 = vmax.f32 %v300_v41, 0.0 }
 0x20d   :  { %v305_v45 = vpack.c.bf16 %v304_v44, %v303_v43 }
 0x20f   :  { %540 = vmatmul.mubr.bf16.vlgmr.msra.gmra.mrb[4].mxu0 %v305_v45 }
 0x2e2   :  { %v411_v47 = vpop.f32.mrb[4].mxu0 }
 0x2e3   :  { %v412_v48 = vadd.f32 %v447_v46, %v411_v47  ;;  %v541_v49 = vpop.f32.mrb[5].mxu0 }
 0x2e4   :  { %v414_v50 = vpop.f32.mrb[6].mxu0 }
 0x2e5   :  { %v418_v51 = vmax.f32 %v412_v48, 0.0  ;;  %v415_v52 = vadd.f32 %v447_v46, %v414_v50  ;;  %v542_v53 = vpop.f32.mrb[7].mxu0 }
 0x2e7   :  { %420 = vst [vmem:[%s799_s7] sm:$0xff] %v418_v51  ;;  %v419_v54 = vmax.f32 %v415_v52, 0.0 }
 0x2e9   :  { %421 = vst [vmem:[%s799_s7 + $0x8] sm:$0xff] %v419_v54 }
 0x2ea   :  { %426 = vsyncpa [#allocation3], 1 }
 0x2eb   :  { %427 = vsyncpa [#allocation5], 1 }

</bundles_post_ra>
